<compile_context>
chip_gen: v6e
topology: v6e:2x2x1
jax: 0.10.0
libtpu: 0.0.40
codegen_flags: <defaults>
</compile_context>

<pallas_src>
import jax
import jax.numpy as jnp
from jax.experimental import pallas as pl
from jax.experimental.pallas import tpu as pltpu

KERNEL = 5            # (5, 5)
STRIDE = 5            # == KERNEL -> non-overlapping patches (fold == placement)
PADDING = 10
MEM_DIM = 256         # faiss.IndexFlatL2(256)
N_MEM = 128           # synthetic memory-bank size (vectors "added" via .add())

SINGLE_TILE_MAX_ROWS = 128   # <= this many query rows -> no-grid whole-array path
MAX_ROW_TILE = 1024          # amortize grid-step overhead for large batches


# ------------------- plain-JAX glue: unfold / fold as pure reshapes --------------
def _unfold(img):
    """torch.nn.functional.unfold(kernel=5, stride=5, padding=10) for one (H, W) image.
    stride == kernel, so this is just pad + reshape + transpose (no strided gathers)."""
    H, W = img.shape
    Lh = (H + 2 * PADDING - KERNEL) // STRIDE + 1
    Lw = (W + 2 * PADDING - KERNEL) // STRIDE + 1
    pad = jnp.pad(img, ((PADDING, PADDING), (PADDING, PADDING)))
    x = pad[:Lh * KERNEL, :Lw * KERNEL].reshape(Lh, KERNEL, Lw, KERNEL)
    return x.transpose(1, 3, 0, 2).reshape(KERNEL * KERNEL, Lh * Lw)       # (25, 256)


def _fold(cols, out_size):
    """Inverse of _unfold; exactly torch fold because STRIDE == KERNEL (no overlap)."""
    H, W = out_size
    Lh = (H + 2 * PADDING - KERNEL) // STRIDE + 1
    Lw = (W + 2 * PADDING - KERNEL) // STRIDE + 1
    x = cols.reshape(KERNEL, KERNEL, Lh, Lw).transpose(2, 0, 3, 1)          # (lh,ki,lw,kj)
    x = x.reshape(Lh * KERNEL, Lw * KERNEL)                                 # (80, 80)
    return x[PADDING:PADDING + H, PADDING:PADDING + W]                      # (64, 64)


def _round_up(x, m):
    return ((x + m - 1) // m) * m


def _choose_tiling(rows):
    """Static (Python) choice of (tile_rows, num_tiles); tile_rows is a multiple of 16."""
    if rows <= SINGLE_TILE_MAX_ROWS:
        return _round_up(max(rows, 8), 16), 1          # single tile, minimal padding
    # >=2 balanced tiles so v7x megacore splits the batch evenly; cap tile size so
    # very large batches still pipeline with reasonably sized DMAs.
    num_tiles = max(2, -(-rows // MAX_ROW_TILE))       # cdiv
    tile = _round_up(-(-rows // num_tiles), 16)
    return tile, num_tiles


# ------------------- Pallas kernel: L2 NN search + reconstruct -------------------
def nn_reconstruct_kernel(q_ref, mb_ref, msq_ref, mf_ref, o_ref):
    q = q_ref[...]            # (TQ, D) bf16 queries (already bf16 from the wrapper)
    mb = mb_ref[...]          # (N,  D) bf16 memory bank (precast in wrapper, resident)
    msq = msq_ref[...]        # (1,  N) f32 precomputed ||m||^2 (resident)

    # scores = q @ m^T with bf16 operands (native MXU rate on v6e/v7x), f32 accumulate.
    # Note: near-tie argmin may differ from exact f32/faiss; margins here are huge.
    scores = jax.lax.dot_general(
        q, mb, (((1,), (1,)), ((), ())), preferred_element_type=jnp.float32)   # (TQ, N)

    # L2 distance up to the per-row constant ||q||^2 (irrelevant for argmin).
    dist = msq - 2.0 * scores                                                   # (TQ, N)

    # argmin over memory axis, first-index tie-break, via lane-min reductions only.
    min_d = jnp.min(dist, axis=-1, keepdims=True)                               # (TQ, 1)
    iota = jax.lax.broadcasted_iota(jnp.int32, dist.shape, 1)                   # (TQ, N)
    big = jnp.int32(dist.shape[-1])
    min_idx = jnp.min(jnp.where(dist <= min_d, iota, big), axis=-1, keepdims=True)
    onehot = (iota == min_idx).astype(jnp.float32)                              # (TQ, N)

    # reconstruct: gather-as-matmul on the MXU, kept f32 so the output is bit-exact.
    o_ref[...] = jnp.dot(onehot, mf_ref[...], preferred_element_type=jnp.float32)


def nn_reconstruct(q_pad, mem_bf16, msq, mem_f32, tile, num_tiles):
    QP, D = q_pad.shape
    N = mem_f32.shape[0]
    out_shape = jax.ShapeDtypeStruct((QP, D), jnp.float32)

    if num_tiles == 1:
        # Single tile: no grid -> no software-pipeline prologue/epilogue, no double
        # buffering; whole arrays sit directly in VMEM (<0.5 MiB total).
        vmem = pl.BlockSpec(memory_space=pltpu.MemorySpace.VMEM)
        return pl.pallas_call(
            nn_reconstruct_kernel,
            out_shape=out_shape,
            in_specs=[vmem, vmem, vmem, vmem],
            out_specs=vmem,
        )(q_pad, mem_bf16, msq, mem_f32)

    # Batched: 1-D grid over balanced, MXU/sublane-aligned row tiles.  The memory
    # bank, its bf16 copy and ||m||^2 are grid-invariant (constant index_map ->
    # fetched once, resident); row tiles are independent -> megacore-parallel (v7x).
    return pl.pallas_call(
        nn_reconstruct_kernel,
        out_shape=out_shape,
        grid=(num_tiles,),
        in_specs=[pl.BlockSpec((tile, D), lambda i: (i, 0)),
                  pl.BlockSpec((N, D), lambda i: (0, 0)),
                  pl.BlockSpec((1, N), lambda i: (0, 0)),
                  pl.BlockSpec((N, D), lambda i: (0, 0))],
        out_specs=pl.BlockSpec((tile, D), lambda i: (i, 0)),
        compiler_params=pltpu.CompilerParams(dimension_semantics=("parallel",)),
    )(q_pad, mem_bf16, msq, mem_f32)


# ------------------- forward ------------------------------------------------------
def neural_mem_forward(images, mem):
    """Pallas-backed NeuralMem.forward.  `images` is (H, W) or (B, H, W); the faiss
    index is modeled as an explicit (N_MEM, 256) f32 memory bank."""
    single = images.ndim == 2
    imgs = images[None] if single else images
    B, H, W = imgs.shape

    q = jax.vmap(_unfold)(imgs.astype(jnp.float32))                  # (B, 25, 256)
    P, D = q.shape[1], q.shape[2]
    rows = B * P
    tile, num_tiles = _choose_tiling(rows)                           # static ints
    QP = tile * num_tiles

    # Queries go to the kernel as bf16 (only ever consumed in bf16) -> half the DMA.
    q_pad = jnp.zeros((QP, D), jnp.bfloat16).at[:rows].set(
        q.reshape(rows, D).astype(jnp.bfloat16))

    # Grid-invariant bank prework hoisted out of the kernel body (computed once).
    mem_f32 = mem.astype(jnp.float32)                                # (N, 256) exact bank
    mem_bf16 = mem_f32.astype(jnp.bfloat16)                          # (N, 256) for scores
    msq = jnp.sum(mem_f32 * mem_f32, axis=1)[None, :]                # (1, N) f32 ||m||^2

    recon = nn_reconstruct(q_pad, mem_bf16, msq, mem_f32, tile, num_tiles)   # (QP, 256)
    cols = recon[:rows].reshape(B, P, D)
    out = jax.vmap(lambda c: _fold(c, (H, W)))(cols)                 # (B, 64, 64)
    return out[0] if single else out


# TODO(synk): faiss.IndexFlatL2 and the streamlit progress bar / st.write have no
# Pallas equivalent; the index is modeled as an in-script (128, 256) bank and the
# UI calls are dropped.
if __name__ == "__main__":
    key = jax.random.PRNGKey(0)
    k_img, k_mem = jax.random.split(key)

    image = jax.random.normal(k_img, (64, 64), dtype=jnp.float32)

    # Memory bank: random vectors + the image's own unfold patterns (simulating
    # NeuralMem.add(image)), so forward reconstructs the image exactly.
    own = _unfold(image)                                             # (25, 256)
    rand = jax.random.normal(k_mem, (N_MEM - own.shape[0], MEM_DIM), dtype=jnp.float32)
    mem = jnp.concatenate([rand, own], axis=0)                       # (128, 256)

    fwd = jax.jit(neural_mem_forward)

    # Single image: 25 query rows -> padded to 32, no-grid whole-array-VMEM path.
    out = jax.block_until_ready(fwd(image, mem))
    assert out.shape == (64, 64), out.shape
    assert jnp.allclose(out, image, atol=1e-4), float(jnp.max(jnp.abs(out - image)))

    # Batched path: 6 images -> 150 query rows -> 2 balanced 80-row tiles (parallel).
    batch = jnp.stack([image] * 6)                                   # (6, 64, 64)
    out_b = jax.block_until_ready(fwd(batch, mem))
    assert out_b.shape == (6, 64, 64), out_b.shape
    assert jnp.allclose(out_b, batch, atol=1e-4), float(jnp.max(jnp.abs(out_b - batch)))

    print("KERNEL_OK")
</pallas_src>

<mosaic_0001>
module attributes {stable_mosaic.version = 11 : i64} {
  func.func @nn_reconstruct_kernel(%arg0: memref<32x256xbf16, #tpu.memory_space<vmem>>, %arg1: memref<128x256xbf16, #tpu.memory_space<vmem>>, %arg2: memref<1x128xf32, #tpu.memory_space<vmem>>, %arg3: memref<128x256xf32, #tpu.memory_space<vmem>>, %arg4: memref<32x256xf32, #tpu.memory_space<vmem>>) attributes {dimension_semantics = [], scalar_prefetch = 0 : i64, scratch_operands = 0 : i64, tpu.core_type = #tpu.core_type<tc>} {
    %c0 = arith.constant 0 : index
    %c0_0 = arith.constant 0 : index
    %0 = vector.load %arg0[%c0, %c0_0] : memref<32x256xbf16, #tpu.memory_space<vmem>>, vector<32x256xbf16>
    %c0_1 = arith.constant 0 : index
    %c0_2 = arith.constant 0 : index
    %1 = vector.load %arg1[%c0_1, %c0_2] : memref<128x256xbf16, #tpu.memory_space<vmem>>, vector<128x256xbf16>
    %c0_3 = arith.constant 0 : index
    %c0_4 = arith.constant 0 : index
    %2 = vector.load %arg2[%c0_3, %c0_4] : memref<1x128xf32, #tpu.memory_space<vmem>>, vector<1x128xf32>
    %cst = arith.constant dense<0.000000e+00> : vector<32x128xf32>
    %3 = tpu.matmul %0, %1, %cst {dimension_numbers = #tpu.dot_dimension_numbers<[1], [1], [0], [0], [0, 0, 1, 0], [], []>} : vector<32x256xbf16>, vector<128x256xbf16>, vector<32x128xf32> -> vector<32x128xf32>
    %cst_5 = arith.constant 2.000000e+00 : f32
    %4 = vector.broadcast %cst_5 : f32 to vector<32x128xf32>
    %5 = arith.mulf %4, %3 : vector<32x128xf32>
    %6 = vector.broadcast %2 : vector<1x128xf32> to vector<32x128xf32>
    %7 = arith.subf %6, %5 : vector<32x128xf32>
    %cst_6 = arith.constant dense<0x7F800000> : vector<32xf32>
    %8 = vector.multi_reduction <minimumf>, %7, %cst_6 [1] : vector<32x128xf32> to vector<32xf32>
    %9 = vector.shape_cast %8 : vector<32xf32> to vector<32x1xf32>
    %10 = tpu.iota {dimensions = array<i32: 1>} : vector<32x128xi32>
    %11 = vector.broadcast %9 : vector<32x1xf32> to vector<32x128xf32>
    %12 = arith.cmpf ole, %7, %11 : vector<32x128xf32>
    %c128_i32 = arith.constant 128 : i32
    %13 = vector.broadcast %c128_i32 : i32 to vector<32x128xi32>
    %14 = arith.select %12, %10, %13 : vector<32x128xi1>, vector<32x128xi32>
    %cst_7 = arith.constant dense<2147483647> : vector<32xi32>
    %15 = vector.multi_reduction <minsi>, %14, %cst_7 [1] : vector<32x128xi32> to vector<32xi32>
    %16 = vector.shape_cast %15 : vector<32xi32> to vector<32x1xi32>
    %17 = vector.broadcast %16 : vector<32x1xi32> to vector<32x128xi32>
    %18 = arith.cmpi eq, %10, %17 : vector<32x128xi32>
    %19 = arith.extui %18 : vector<32x128xi1> to vector<32x128xi32>
    %20 = arith.sitofp %19 : vector<32x128xi32> to vector<32x128xf32>
    %c0_8 = arith.constant 0 : index
    %c0_9 = arith.constant 0 : index
    %21 = vector.load %arg3[%c0_8, %c0_9] : memref<128x256xf32, #tpu.memory_space<vmem>>, vector<128x256xf32>
    %cst_10 = arith.constant dense<0.000000e+00> : vector<32x256xf32>
    %22 = tpu.matmul %20, %21, %cst_10 {dimension_numbers = #tpu.dot_dimension_numbers<[1], [0], [0], [1], [0, 0, 1, 1], [], []>} : vector<32x128xf32>, vector<128x256xf32>, vector<32x256xf32> -> vector<32x256xf32>
    %c0_11 = arith.constant 0 : index
    %c0_12 = arith.constant 0 : index
    %23 = vector.load %arg4[%c0_11, %c0_12] : memref<32x256xf32, #tpu.memory_space<vmem>>, vector<32x256xf32>
    tpu.vector_store %arg4[%c0_11, %c0_12], %22 {strides = array<i32>} : memref<32x256xf32, #tpu.memory_space<vmem>>, vector<32x256xf32>,
    return
  }
}

</mosaic_0001>

<bundles_post_ra>
// kernel: neural_mem_forward.1
= control target key start
LH: loop header
LB: loop body
LE: loop exit
PB: predicated region body
PF: predicated region fallthrough
CT: control target
= control target key end

     0   :  { %v210_v37 = vlaneseq  ;;  %s734_s1 = inlined_call_operand.vmem [shape: bf16[128,256], index: 1, kind: input, shape index: {}]   ;;  %s735_s0 = inlined_call_operand.vmem [shape: bf16[32,256], index: 0, kind: input, shape index: {}]   ;;  %s736_s2 = inlined_call_operand.vmem [shape: f32[1,128], index: 2, kind: input, shape index: {}]   ;;  %s737_s3 = inlined_call_operand.vmem [shape: f32[128,256], index: 3, kind: input, shape index: {}]   ;;  %s738_s4 = inlined_call_operand.vmem [shape: f32[32,256], index: 4, kind: output, shape index: {}]  }
   0x1   :  { %v452_v0 = vld [vmem:[%s734_s1 + $0x74] ss:$8 sps:$4 sm:$0xff]   ;;  %v454_v1 = vld [vmem:[%s734_s1 + $0x70] ss:$8 sps:$4 sm:$0xff]   ;;  %v455_v2 = vld [vmem:[%s734_s1 + $0x64] ss:$8 sps:$4 sm:$0xff]  }
   0x2   :  { %139 = vmatprep.subr.bf16.mxu0 %v452_v0  ;;  %v457_v3 = vld [vmem:[%s734_s1 + $0x60] ss:$8 sps:$4 sm:$0xff]   ;;  %v458_v4 = vld [vmem:[%s734_s1 + $0x54] ss:$8 sps:$4 sm:$0xff]   ;;  %v478_v5 = vld [vmem:[%s735_s0 + $0x4] ss:$8 sps:$4 sm:$0xff]  }
   0x3   :  { %140 = vmatpush1.bf16.xpose.msra.mxu0 %v454_v1  ;;  %171 = vmatprep.mubr.bf16.mxu0 %v478_v5  ;;  %v460_v6 = vld [vmem:[%s734_s1 + $0x50] ss:$8 sps:$4 sm:$0xff]   ;;  %v461_v7 = vld [vmem:[%s734_s1 + $0x44] ss:$8 sps:$4 sm:$0xff]   ;;  %v463_v8 = vld [vmem:[%s734_s1 + $0x40] ss:$8 sps:$4 sm:$0xff]  }
   0x4   :  { %141 = vmatprep.subr.bf16.mxu0 %v455_v2  ;;  %v464_v9 = vld [vmem:[%s734_s1 + $0x34] ss:$8 sps:$4 sm:$0xff]   ;;  %v466_v10 = vld [vmem:[%s734_s1 + $0x30] ss:$8 sps:$4 sm:$0xff]   ;;  %v467_v11 = vld [vmem:[%s734_s1 + $0x24] ss:$8 sps:$4 sm:$0xff]  }
   0x5   :  { %v469_v12 = vld [vmem:[%s734_s1 + $0x20] ss:$8 sps:$4 sm:$0xff]   ;;  %v470_v13 = vld [vmem:[%s734_s1 + $0x14] ss:$8 sps:$4 sm:$0xff]   ;;  %v472_v14 = vld [vmem:[%s734_s1 + $0x10] ss:$8 sps:$4 sm:$0xff]  }
   0x6   :  { %v473_v15 = vld [vmem:[%s734_s1 + $0x4] ss:$8 sps:$4 sm:$0xff]   ;;  %v475_v16 = vld [vmem:[%s734_s1] ss:$8 sps:$4 sm:$0xff]   ;;  %v479_v18 = vld [vmem:[%s735_s0 + $0x14] ss:$8 sps:$4 sm:$0xff]  }
   0x7   :  { %v476_v17 = vld [vmem:[%s735_s0] ss:$8 sps:$4 sm:$0xff]   ;;  %v481_v19 = vld [vmem:[%s735_s0 + $0x10] ss:$8 sps:$4 sm:$0xff]   ;;  %v572_v38 = vand.u32 127, %v210_v37 }
   0x8   :  { %v441_v21 = vld [vmem:[%s736_s2] ss:$0 sm:$0xff]  ;;  %v319_v55 = vld [vmem:[%s737_s3 + $0xf8] sm:$0xff]  ;;  %v318_v56 = vld [vmem:[%s737_s3 + $0xf0] sm:$0xff] }
   0x9   :  { %v317_v57 = vld [vmem:[%s737_s3 + $0xe8] sm:$0xff]  ;;  %320 = vmatprep.subr.mxu1 %v319_v55  ;;  %v316_v58 = vld [vmem:[%s737_s3 + $0xe0] sm:$0xff]  ;;  %v315_v59 = vld [vmem:[%s737_s3 + $0xd8] sm:$0xff] }
   0xa   :  { %321 = vmatpush1.msra.mxu1 %v318_v56  ;;  %v314_v60 = vld [vmem:[%s737_s3 + $0xd0] sm:$0xff]  ;;  %v313_v61 = vld [vmem:[%s737_s3 + $0xc8] sm:$0xff]  ;;  %v312_v62 = vld [vmem:[%s737_s3 + $0xc0] sm:$0xff] }
   0xb   :  { %142 = vmatpush1.bf16.xpose.msra.mxu0 %v457_v3  ;;  %322 = vmatprep.subr.mxu1 %v317_v57  ;;  %v311_v63 = vld [vmem:[%s737_s3 + $0xb8] sm:$0xff]  ;;  %v310_v0 = vld [vmem:[%s737_s3 + $0xb0] sm:$0xff]  ;;  %v309_v1 = vld [vmem:[%s737_s3 + $0xa8] sm:$0xff] }
   0xc   :  { %143 = vmatprep.subr.bf16.mxu0 %v458_v4  ;;  %323 = vmatpush1.msra.mxu1 %v316_v58  ;;  %v308_v2 = vld [vmem:[%s737_s3 + $0xa0] sm:$0xff]  ;;  %v307_v3 = vld [vmem:[%s737_s3 + $0x98] sm:$0xff]  ;;  %v306_v4 = vld [vmem:[%s737_s3 + $0x90] sm:$0xff] }
   0xd   :  { %324 = vmatprep.subr.mxu1 %v315_v59  ;;  %v305_v5 = vld [vmem:[%s737_s3 + $0x88] sm:$0xff] }
   0xe   :  { %325 = vmatpush1.msra.mxu1 %v314_v60  ;;  %v289_v37 = vld [vmem:[%s737_s3 + $0x8] sm:$0xff] }
   0xf   :  { %326 = vmatprep.subr.mxu1 %v313_v61 }
  0x10   :  { %327 = vmatpush1.msra.mxu1 %v312_v62 }
  0x11   :  { %328 = vmatprep.subr.mxu1 %v311_v63 }
  0x12   :  { %329 = vmatpush1.msra.mxu1 %v310_v0 }
  0x13   :  { %144 = vmatpush1.bf16.xpose.msra.mxu0 %v460_v6  ;;  %330 = vmatprep.subr.mxu1 %v309_v1  ;;  %v304_v6 = vld [vmem:[%s737_s3 + $0x80] sm:$0xff] }
  0x14   :  { %145 = vmatprep.subr.bf16.mxu0 %v461_v7  ;;  %331 = vmatpush1.msra.mxu1 %v308_v2  ;;  %v303_v7 = vld [vmem:[%s737_s3 + $0x78] sm:$0xff] }
  0x15   :  { %332 = vmatprep.subr.mxu1 %v307_v3 }
  0x16   :  { %333 = vmatpush1.msra.mxu1 %v306_v4 }
  0x17   :  { %334 = vmatprep.subr.mxu1 %v305_v5 }
  0x18   :  { %335 = vmatpush1.msra.mxu1 %v304_v6 }
  0x19   :  { %336 = vmatprep.subr.mxu1 %v303_v7 }
  0x1b   :  { %146 = vmatpush1.bf16.xpose.msra.mxu0 %v463_v8  ;;  %v302_v8 = vld [vmem:[%s737_s3 + $0x70] sm:$0xff] }
  0x1c   :  { %147 = vmatprep.subr.bf16.mxu0 %v464_v9  ;;  %v301_v9 = vld [vmem:[%s737_s3 + $0x68] sm:$0xff]  ;;  %337 = vmatpush1.msra.mxu1 %v302_v8 }
  0x1d   :  { %338 = vmatprep.subr.mxu1 %v301_v9 }
  0x23   :  { %148 = vmatpush1.bf16.xpose.msra.mxu0 %v466_v10  ;;  %v300_v10 = vld [vmem:[%s737_s3 + $0x60] sm:$0xff] }
  0x24   :  { %149 = vmatprep.subr.bf16.mxu0 %v467_v11  ;;  %v299_v11 = vld [vmem:[%s737_s3 + $0x58] sm:$0xff]  ;;  %339 = vmatpush1.msra.mxu1 %v300_v10 }
  0x25   :  { %340 = vmatprep.subr.mxu1 %v299_v11 }
  0x2b   :  { %150 = vmatpush1.bf16.xpose.msra.mxu0 %v469_v12  ;;  %v298_v12 = vld [vmem:[%s737_s3 + $0x50] sm:$0xff] }
  0x2c   :  { %151 = vmatprep.subr.bf16.mxu0 %v470_v13  ;;  %v297_v13 = vld [vmem:[%s737_s3 + $0x48] sm:$0xff]  ;;  %341 = vmatpush1.msra.mxu1 %v298_v12 }
  0x2d   :  { %342 = vmatprep.subr.mxu1 %v297_v13 }
  0x33   :  { %152 = vmatpush1.bf16.xpose.msra.mxu0 %v472_v14  ;;  %v296_v14 = vld [vmem:[%s737_s3 + $0x40] sm:$0xff] }
  0x34   :  { %153 = vmatprep.subr.bf16.mxu0 %v473_v15  ;;  %v295_v15 = vld [vmem:[%s737_s3 + $0x38] sm:$0xff]  ;;  %343 = vmatpush1.msra.mxu1 %v296_v14 }
  0x35   :  { %344 = vmatprep.subr.mxu1 %v295_v15 }
  0x3b   :  { %154 = vmatpush1.bf16.xpose.msra.mxu0 %v475_v16  ;;  %v294_v16 = vld [vmem:[%s737_s3 + $0x30] sm:$0xff] }
  0x3c   :  { %345 = vmatpush1.msra.mxu1 %v294_v16 }
  0x42   :  { %172 = vmatmul.mubr.bf16.vlgmr.msra.gmra.mxu0 %v476_v17  ;;  %v293_v17 = vld [vmem:[%s737_s3 + $0x28] sm:$0xff] }
  0x43   :  { %179 = vmatprep.mubr.bf16.mxu0 %v479_v18  ;;  %346 = vmatprep.subr.mxu1 %v293_v17 }
  0x4a   :  { %180 = vmatmul.mubr.bf16.gmra.mxu0 %v481_v19 }
 0x102   :  { %v173_v20 = vpop.f32.mrf.mxu0 }
 0x103   :  { %v188_v22 = vmul.f32 2.0, %v173_v20 }
 0x104   :  { %v175_v23 = vpop.f32.mrf.mxu0 }
 0x105   :  { %v198_v24 = vsub.f32 %v441_v21, %v188_v22 }
 0x106   :  { %v176_v25 = vpop.f32.mrf.mxu0 }
 0x107   :  { %v189_v26 = vmul.f32 2.0, %v176_v25  ;;  %202 = vmin.xlane.f32.xlu0 %v198_v24 }
 0x108   :  { %v178_v27 = vpop.f32.mrf.mxu0 }
 0x109   :  { %v199_v28 = vsub.f32 %v441_v21, %v189_v26 }
 0x10a   :  { %v181_v29 = vpop.f32.mrf.mxu0 }
 0x10b   :  { %v190_v30 = vmul.f32 2.0, %v181_v29  ;;  %204 = vmin.xlane.f32.xlu0 %v199_v28 }
 0x10c   :  { %v183_v31 = vpop.f32.mrf.mxu0 }
 0x10d   :  { %v200_v32 = vsub.f32 %v441_v21, %v190_v30 }
 0x10e   :  { %v184_v33 = vpop.f32.mrf.mxu0 }
 0x10f   :  { %v191_v34 = vmul.f32 2.0, %v184_v33  ;;  %206 = vmin.xlane.f32.xlu1 %v200_v32  ;;  %v292_v33 = vld [vmem:[%s737_s3 + $0x20] sm:$0xff] }
 0x110   :  { %v186_v35 = vpop.f32.mrf.mxu0  ;;  %347 = vmatpush1.msra.mxu1 %v292_v33 }
 0x111   :  { %v201_v36 = vsub.f32 %v441_v21, %v191_v34  ;;  %v291_v34 = vld [vmem:[%s737_s3 + $0x18] sm:$0xff] }
 0x112   :  { %348 = vmatprep.subr.mxu1 %v291_v34 }
 0x113   :  { %208 = vmin.xlane.f32.xlu1 %v201_v36 }
 0x190   :  { %v203_v39 = vpop.xlane.xlu0 %202 }
 0x191   :  { %vm212_vm0 = vcmp.le.f32.partialorder %v198_v24, %v203_v39  ;;  %v288_v39 = vld [vmem:[%s737_s3] sm:$0xff] }
 0x192   :  { %v575_v40 = vsel %vm212_vm0, %v572_v38, 128 }
 0x193   :  { %v221_v41 = vshra.s32 %v575_v40, 16  ;;  %v220_v18 = vand.u32 65535, %v575_v40  ;;  %v482_v40 = vmov 0.0  }
 0x194   :  { %v205_v42 = vpop.xlane.xlu0 %204  ;;  %384 = vmatprep.mubr.f32.mxu1 %v482_v40 }
 0x195   :  { %vm213_vm1 = vcmp.le.f32.partialorder %v199_v28, %v205_v42  ;;  %v578_v43 = vcvt.s32.f32 %v221_v41  ;;  %v222_v21 = vcvt.s32.f32 %v220_v18 }
 0x196   :  { %v581_v44 = vsel %vm213_vm1, %v572_v38, 128 }
 0x197   :  { %224 = vmin.xlane.f32.xlu0 %v578_v43  ;;  %v235_v45 = vshra.s32 %v581_v44, 16  ;;  %v234_v19 = vand.u32 65535, %v581_v44 }
 0x198   :  { %v207_v46 = vpop.xlane.xlu1 %206 }
 0x199   :  { %vm214_vm2 = vcmp.le.f32.partialorder %v200_v32, %v207_v46  ;;  %v585_v47 = vcvt.s32.f32 %v235_v45  ;;  %v236_v25 = vcvt.s32.f32 %v234_v19 }
 0x19a   :  { %v588_v48 = vsel %vm214_vm2, %v572_v38, 128 }
 0x19b   :  { %238 = vmin.xlane.f32.xlu1 %v585_v47  ;;  %v249_v49 = vshra.s32 %v588_v48, 16  ;;  %v248_v23 = vand.u32 65535, %v588_v48 }
 0x19c   :  { %v209_v50 = vpop.xlane.xlu1 %208 }
 0x19d   :  { %vm215_vm3 = vcmp.le.f32.partialorder %v201_v36, %v209_v50  ;;  %v592_v51 = vcvt.s32.f32 %v249_v49  ;;  %v250_v29 = vcvt.s32.f32 %v248_v23  ;;  %v290_v36 = vld [vmem:[%s737_s3 + $0x10] sm:$0xff] }
 0x19e   :  { %v595_v52 = vsel %vm215_vm3, %v572_v38, 128  ;;  %349 = vmatpush1.msra.mxu1 %v290_v36 }
 0x19f   :  { %252 = vmin.xlane.f32.xlu0 %v592_v51  ;;  %v263_v53 = vshra.s32 %v595_v52, 16  ;;  %v262_v27 = vand.u32 65535, %v595_v52  ;;  %350 = vmatprep.subr.mxu1 %v289_v37 }
 0x1a0   :  { %351 = vmatpush1.msra.mxu1 %v288_v39 }
 0x1a1   :  { %v599_v54 = vcvt.s32.f32 %v263_v53  ;;  %v264_v32 = vcvt.s32.f32 %v262_v27 }
 0x1a3   :  { %266 = vmin.xlane.f32.xlu1 %v599_v54 }
 0x220   :  { %v225_v20 = vpop.xlane.xlu0 %224 }
 0x221   :  { %vm226_vm4 = vcmp.eq.f32.partialorder %v578_v43, %v225_v20  ;;  %v231_v41 = vcvt.f32.s32 %v225_v20 }
 0x222   :  { %v227_v22 = vsel %vm226_vm4, %v222_v21, inf }
 0x223   :  { %228 = vmin.xlane.f32.xlu0 %v227_v22  ;;  %v232_v43 = vshll.u32 %v231_v41, 16 }
 0x224   :  { %v239_v24 = vpop.xlane.xlu1 %238 }
 0x225   :  { %vm240_vm5 = vcmp.eq.f32.partialorder %v585_v47, %v239_v24  ;;  %v245_v44 = vcvt.f32.s32 %v239_v24 }
 0x226   :  { %v241_v26 = vsel %vm240_vm5, %v236_v25, inf }
 0x227   :  { %242 = vmin.xlane.f32.xlu1 %v241_v26  ;;  %v246_v48 = vshll.u32 %v245_v44, 16 }
 0x228   :  { %v253_v28 = vpop.xlane.xlu0 %252 }
 0x229   :  { %vm254_vm6 = vcmp.eq.f32.partialorder %v592_v51, %v253_v28  ;;  %v259_v49 = vcvt.f32.s32 %v253_v28  ;;  %v483_v51 = vmov 1.0  }
 0x22a   :  { %v255_v30 = vsel %vm254_vm6, %v250_v29, inf }
 0x22b   :  { %256 = vmin.xlane.f32.xlu0 %v255_v30 }
 0x22c   :  { %v267_v31 = vpop.xlane.xlu1 %266 }
 0x22d   :  { %vm268_vm7 = vcmp.eq.f32.partialorder %v599_v54, %v267_v31  ;;  %v260_v54 = vshll.u32 %v259_v49, 16  ;;  %v273_v55 = vcvt.f32.s32 %v267_v31 }
 0x22e   :  { %v269_v35 = vsel %vm268_vm7, %v264_v32, inf }
 0x22f   :  { %270 = vmin.xlane.f32.xlu1 %v269_v35  ;;  %v274_v59 = vshll.u32 %v273_v55, 16 }
 0x2ac   :  { %v229_v42 = vpop.xlane.xlu0 %228 }
 0x2ad   :  { %v230_v45 = vcvt.f32.s32 %v229_v42 }
 0x2af   :  { %v233_v46 = vadd.s32 %v232_v43, %v230_v45 }
 0x2b0   :  { %v243_v47 = vpop.xlane.xlu1 %242 }
 0x2b1   :  { %v244_v50 = vcvt.f32.s32 %v243_v47  ;;  %vm276_vm8 = vcmp.eq.s32.totalorder %v572_v38, %v233_v46 }
 0x2b2   :  { %446 = vmatmul.mubr.msk.f32.vlgmr.msra.gmra.mxu1 %vm276_vm8, %v483_v51 }
 0x2b3   :  { %v247_v52 = vadd.s32 %v246_v48, %v244_v50  ;;  %390 = vmatprep.mubr.f32.mxu1 %v482_v40 }
 0x2b4   :  { %v257_v53 = vpop.xlane.xlu0 %256 }
 0x2b5   :  { %v258_v56 = vcvt.f32.s32 %v257_v53  ;;  %vm277_vm9 = vcmp.eq.s32.totalorder %v572_v38, %v247_v52 }
 0x2b6   :  { %447 = vmatmul.mubr.msk.f32.gmra.mxu1 %vm277_vm9, %v483_v51 }
 0x2b7   :  { %v261_v57 = vadd.s32 %v260_v54, %v258_v56  ;;  %396 = vmatprep.mubr.f32.mxu1 %v482_v40 }
 0x2b8   :  { %v271_v58 = vpop.xlane.xlu1 %270 }
 0x2b9   :  { %v272_v60 = vcvt.f32.s32 %v271_v58  ;;  %vm278_vm10 = vcmp.eq.s32.totalorder %v572_v38, %v261_v57 }
 0x2ba   :  { %448 = vmatmul.mubr.msk.f32.gmra.mxu1 %vm278_vm10, %v483_v51 }
 0x2bb   :  { %v275_v61 = vadd.s32 %v274_v59, %v272_v60  ;;  %402 = vmatprep.mubr.f32.mxu1 %v482_v40 }
 0x2bd   :  { %vm279_vm11 = vcmp.eq.s32.totalorder %v572_v38, %v275_v61 }
 0x2be   :  { %449 = vmatmul.mubr.msk.f32.gmra.mxu1 %vm279_vm11, %v483_v51 }
 0x372   :  { %v386_v62 = vpop.f32.mrf.mxu1 }
 0x373   :  { %409 = vst [vmem:[%s738_s4] sm:$0xff] %v386_v62 }
 0x374   :  { %v388_v63 = vpop.f32.mrf.mxu1 }
 0x375   :  { %410 = vst [vmem:[%s738_s4 + $0x8] sm:$0xff] %v388_v63 }
 0x376   :  { %v392_v0 = vpop.f32.mrf.mxu1 }
 0x377   :  { %411 = vst [vmem:[%s738_s4 + $0x10] sm:$0xff] %v392_v0 }
 0x378   :  { %v394_v1 = vpop.f32.mrf.mxu1 }
 0x379   :  { %412 = vst [vmem:[%s738_s4 + $0x18] sm:$0xff] %v394_v1 }
 0x37a   :  { %v398_v38 = vpop.f32.mrf.mxu1 }
 0x37b   :  { %413 = vst [vmem:[%s738_s4 + $0x20] sm:$0xff] %v398_v38 }
 0x37c   :  { %v400_v2 = vpop.f32.mrf.mxu1 }
 0x37d   :  { %414 = vst [vmem:[%s738_s4 + $0x28] sm:$0xff] %v400_v2 }
 0x37e   :  { %v404_v3 = vpop.f32.mrf.mxu1 }
 0x37f   :  { %415 = vst [vmem:[%s738_s4 + $0x30] sm:$0xff] %v404_v3 }
 0x380   :  { %v406_v4 = vpop.f32.mrf.mxu1 }
 0x381   :  { %416 = vst [vmem:[%s738_s4 + $0x38] sm:$0xff] %v406_v4 }

</bundles_post_ra>
